<compile_context>
chip_gen: v7x
topology: tpu7x:2x2x1
jax: 0.10.0
libtpu: 0.0.40
codegen_flags: <defaults>
</compile_context>

<pallas_src>
import jax
import jax.numpy as jnp
from jax.experimental import pallas as pl
from jax.experimental.pallas import tpu as pltpu


# -----------------------------------------------------------------------------
# Pallas kernel: fused Regressor4VID mean path
#   mean_tile = W3 @ relu(W2 @ relu(W1 @ x_tile))   (1x1 convs == channel matmuls)
# -----------------------------------------------------------------------------
def _vid_regressor_kernel(x_ref, w1_ref, w2_ref, w3_ref, mean_ref):
    # x_ref:    (1, C_in, t)   feature-map tile (spatial axis on lanes)
    # w1_ref:   (C_mid, C_in)  conv1 weight (PyTorch conv layout, 1x1 squeezed)
    # w2_ref:   (C_mid, C_mid) conv2 weight
    # w3_ref:   (C_out, C_mid) conv3 weight
    # mean_ref: (1, C_out, t)
    x = x_ref[0]  # (C_in, t)
    h1 = jnp.maximum(
        jnp.dot(w1_ref[...], x, preferred_element_type=jnp.float32), 0.0)
    h2 = jnp.maximum(
        jnp.dot(w2_ref[...], h1, preferred_element_type=jnp.float32), 0.0)
    mean_ref[0] = jnp.dot(
        w3_ref[...], h2, preferred_element_type=jnp.float32).astype(mean_ref.dtype)


def _pick_tile_hw(hw, c_in, c_mid, c_out, in_itemsize, out_itemsize,
                  *, max_tile=2048, vmem_budget_bytes=12 << 20):
    """Largest spatial tile that (a) is a multiple of 128, (b) divides HW and
    (c) keeps double-buffered in/out blocks + f32 intermediates under a VMEM
    budget.  Falls back to the full spatial extent (block == full dim is always
    a legal BlockSpec)."""
    # bytes needed per lane-column: 2x double-buffered x/out blocks + h1/h2 f32.
    bytes_per_col = (2 * (c_in * in_itemsize + c_out * out_itemsize)
                     + 2 * c_mid * 4)
    cap = max(128, (vmem_budget_bytes // max(bytes_per_col, 1)) // 128 * 128)
    cap = min(cap, max_tile)
    if hw <= cap:
        return hw
    for t in range(cap, 127, -128):
        if hw % t == 0:
            return t
    # TODO(synk): H*W with no 128-multiple divisor <= cap falls back to a single
    # full-extent block; fine for typical CNN feature-map sizes.
    return hw


def regressor4vid_forward(x_nchw, w1, w2, w3, soft_plus_param, eps,
                          *, max_tile_hw=2048, out_dtype=None):
    """Pallas implementation of Regressor4VID.forward.

    Args:
      x_nchw:          (N, C_in, H, W) student feature map (PyTorch NCHW).
      w1, w2, w3:      1x1 conv weights in PyTorch layout (kernel dims squeezed):
                       (C_mid, C_in), (C_mid, C_mid), (C_out, C_mid).
      soft_plus_param: (C_out,) parameter.
      eps:             python float.
      out_dtype:       dtype of pred_mean (default: x dtype).

    Returns:
      pred_mean: (N, C_out, H, W)
      pred_var:  (1, C_out, 1, 1)
    """
    N, C_in, H, W = x_nchw.shape
    C_mid = w1.shape[0]
    C_out = w3.shape[0]
    HW = H * W
    out_dtype = x_nchw.dtype if out_dtype is None else out_dtype

    # NCHW -> (N, C_in, H*W): pure reshape, no transpose / no padding.
    x_flat = x_nchw.reshape(N, C_in, HW)

    itemsize_in = jnp.dtype(x_nchw.dtype).itemsize
    itemsize_out = jnp.dtype(out_dtype).itemsize
    tile_hw = _pick_tile_hw(HW, C_in, C_mid, C_out, itemsize_in, itemsize_out,
                            max_tile=max_tile_hw)
    grid = (N, HW // tile_hw)

    cost = pl.CostEstimate(
        flops=2 * N * HW * (C_in * C_mid + C_mid * C_mid + C_mid * C_out),
        transcendentals=0,
        bytes_accessed=(N * HW * (C_in * itemsize_in + C_out * itemsize_out)
                        + 4 * (C_in * C_mid + C_mid * C_mid + C_mid * C_out)),
    )

    mean_flat = pl.pallas_call(
        _vid_regressor_kernel,
        out_shape=jax.ShapeDtypeStruct((N, C_out, HW), out_dtype),
        grid_spec=pltpu.PrefetchScalarGridSpec(
            num_scalar_prefetch=0,
            grid=grid,
            in_specs=[
                pl.BlockSpec((1, C_in, tile_hw), lambda n, j: (n, 0, j)),
                pl.BlockSpec((C_mid, C_in), lambda n, j: (0, 0)),
                pl.BlockSpec((C_mid, C_mid), lambda n, j: (0, 0)),
                pl.BlockSpec((C_out, C_mid), lambda n, j: (0, 0)),
            ],
            out_specs=pl.BlockSpec((1, C_out, tile_hw), lambda n, j: (n, 0, j)),
        ),
        compiler_params=pltpu.CompilerParams(
            dimension_semantics=("parallel", "parallel")),
        cost_estimate=cost,
    )(x_flat, w1, w2, w3)

    pred_mean = mean_flat.reshape(N, C_out, H, W)

    # pred_var = softplus(param) + eps, only C_out elements: plain JAX (keeps
    # the Pallas grid fully parallel and avoids a finalize step).
    pred_var = (jax.nn.softplus(soft_plus_param.astype(jnp.float32))
                + jnp.float32(eps)).reshape(1, C_out, 1, 1)
    return pred_mean, pred_var


# -----------------------------------------------------------------------------
# VariationalDistributor4VID (JAX/Pallas version)
# -----------------------------------------------------------------------------
class Regressor4VID:
    def __init__(self, key, in_channels, middle_channels, out_channels,
                 eps, init_pred_var):
        k1, k2, k3 = jax.random.split(key, 3)
        # 1x1 conv weights in PyTorch conv layout (out_ch, in_ch), kaiming-ish scale.
        self.w1 = (jax.random.normal(k1, (middle_channels, in_channels), jnp.float32)
                   * (2.0 / in_channels) ** 0.5)
        self.w2 = (jax.random.normal(k2, (middle_channels, middle_channels), jnp.float32)
                   * (2.0 / middle_channels) ** 0.5)
        self.w3 = (jax.random.normal(k3, (out_channels, middle_channels), jnp.float32)
                   * (2.0 / middle_channels) ** 0.5)
        # soft_plus_param = log(exp(init_pred_var - eps) - 1) * ones(out_channels)
        self.soft_plus_param = jnp.full(
            (out_channels,),
            jnp.log(jnp.exp(jnp.float32(init_pred_var - eps)) - 1.0),
            dtype=jnp.float32)
        self.eps = eps
        self.init_pred_var = init_pred_var

    def __call__(self, student_feature_map):
        return regressor4vid_forward(
            student_feature_map, self.w1, self.w2, self.w3,
            self.soft_plus_param, self.eps)


class VariationalDistributor4VID:
    """Forward runs the student model; post_forward runs each VID regressor on
    the hooked intermediate feature maps (the Pallas hot path)."""

    def __init__(self, student_model, regressors, key):
        # TODO(synk): wrap_if_distributed (DDP wrapping) has no Pallas
        # equivalent; single-device only.
        self.student_model = student_model
        self.regressor_dict = {}
        self.io_path_pairs = []
        keys = jax.random.split(key, max(len(regressors), 1))
        for k, (regressor_key, params) in zip(keys, regressors.items()):
            self.regressor_dict[regressor_key] = Regressor4VID(
                k,
                in_channels=params['in_channels'],
                middle_channels=params['middle_channels'],
                out_channels=params['out_channels'],
                eps=params['eps'],
                init_pred_var=params['init_pred_var'])
            self.io_path_pairs.append(
                (regressor_key, params['io'], params['path']))

    def forward(self, x):
        return self.student_model(x)

    def post_forward(self, io_dict):
        results = {}
        for regressor_key, io_type, module_path in self.io_path_pairs:
            results[regressor_key] = self.regressor_dict[regressor_key](
                io_dict[module_path][io_type])
        return results


def _reference_regressor(x_nchw, reg):
    """Pure-JAX reference for correctness checking."""
    N, C, H, W = x_nchw.shape
    xf = jnp.transpose(x_nchw, (0, 2, 3, 1)).reshape(-1, C)      # (P, C_in)
    h1 = jnp.maximum(xf @ reg.w1.T, 0.0)
    h2 = jnp.maximum(h1 @ reg.w2.T, 0.0)
    mean = (h2 @ reg.w3.T).reshape(N, H, W, -1).transpose(0, 3, 1, 2)
    var = (jax.nn.softplus(reg.soft_plus_param) + reg.eps).reshape(1, -1, 1, 1)
    return mean, var


if __name__ == "__main__":
    key = jax.random.PRNGKey(0)
    k_x, k_mod = jax.random.split(key)

    # Small shapes: batch=2, in_channels=4, spatial=16x16, middle=16, out=8.
    N, C_in, H, W = 2, 4, 16, 16
    regressors = {
        "reg0": dict(in_channels=C_in, middle_channels=16, out_channels=8,
                     eps=1e-6, init_pred_var=5.0,
                     io="output", path="layer1"),
    }

    # Stand-in student model (the real one is user-supplied): identity.
    # TODO(synk): the real student_model is arbitrary user code, not part of
    # this kernel.
    student_model = lambda x: x

    module = VariationalDistributor4VID(student_model, regressors, k_mod)

    x = jax.random.normal(k_x, (N, C_in, H, W), jnp.float32)

    # forward: runs the student
    student_out = module.forward(x)

    # post_forward: runs the Pallas VID regressor on the hooked feature map
    io_dict = {"layer1": {"output": student_out}}
    results = module.post_forward(io_dict)
    pred_mean, pred_var = results["reg0"]
    jax.block_until_ready((pred_mean, pred_var))

    # Check against pure-JAX reference.
    ref_mean, ref_var = _reference_regressor(student_out, module.regressor_dict["reg0"])
    assert pred_mean.shape == (N, 8, H, W)
    assert pred_var.shape == (1, 8, 1, 1)
    assert jnp.allclose(pred_mean, ref_mean, atol=1e-4, rtol=1e-4)
    assert jnp.allclose(pred_var, ref_var, atol=1e-6, rtol=1e-6)

    print("KERNEL_OK")
</pallas_src>

<mosaic_0001>
module attributes {stable_mosaic.version = 11 : i64} {
  func.func @_vid_regressor_kernel(%arg0: i32, %arg1: i32, %arg2: memref<1x4x256xf32, #tpu.memory_space<vmem>>, %arg3: memref<16x4xf32, #tpu.memory_space<vmem>>, %arg4: memref<16x16xf32, #tpu.memory_space<vmem>>, %arg5: memref<8x16xf32, #tpu.memory_space<vmem>>, %arg6: memref<1x8x256xf32, #tpu.memory_space<vmem>>) attributes {dimension_semantics = [#tpu.dimension_semantics<parallel>, #tpu.dimension_semantics<parallel>], iteration_bounds = array<i64: 2, 1>, scalar_prefetch = 0 : i64, scratch_operands = 0 : i64, tpu.core_type = #tpu.core_type<tc>, window_params = [{transform_indices = @transform_0, window_bounds = array<i64: 1, 4, 256>}, {pipeline_mode = #tpu.pipeline_mode<synchronous>, transform_indices = @transform_1, window_bounds = array<i64: 16, 4>}, {pipeline_mode = #tpu.pipeline_mode<synchronous>, transform_indices = @transform_2, window_bounds = array<i64: 16, 16>}, {pipeline_mode = #tpu.pipeline_mode<synchronous>, transform_indices = @transform_3, window_bounds = array<i64: 8, 16>}, {transform_indices = @transform_4, window_bounds = array<i64: 1, 8, 256>}]} {
    %c0 = arith.constant 0 : index
    %c0_0 = arith.constant 0 : index
    %c0_1 = arith.constant 0 : index
    %0 = vector.load %arg2[%c0, %c0_0, %c0_1] : memref<1x4x256xf32, #tpu.memory_space<vmem>>, vector<1x4x256xf32>
    %1 = vector.shape_cast %0 : vector<1x4x256xf32> to vector<4x256xf32>
    %c0_2 = arith.constant 0 : index
    %c0_3 = arith.constant 0 : index
    %2 = vector.load %arg3[%c0_2, %c0_3] : memref<16x4xf32, #tpu.memory_space<vmem>>, vector<16x4xf32>
    %cst = arith.constant dense<0.000000e+00> : vector<16x256xf32>
    %3 = tpu.matmul %2, %1, %cst {dimension_numbers = #tpu.dot_dimension_numbers<[1], [0], [0], [1], [0, 0, 1, 1], [], []>} : vector<16x4xf32>, vector<4x256xf32>, vector<16x256xf32> -> vector<16x256xf32>
    %cst_4 = arith.constant 0.000000e+00 : f32
    %4 = vector.broadcast %cst_4 : f32 to vector<16x256xf32>
    %5 = arith.maximumf %3, %4 : vector<16x256xf32>
    %c0_5 = arith.constant 0 : index
    %c0_6 = arith.constant 0 : index
    %6 = vector.load %arg4[%c0_5, %c0_6] : memref<16x16xf32, #tpu.memory_space<vmem>>, vector<16x16xf32>
    %cst_7 = arith.constant dense<0.000000e+00> : vector<16x256xf32>
    %7 = tpu.matmul %6, %5, %cst_7 {dimension_numbers = #tpu.dot_dimension_numbers<[1], [0], [0], [1], [0, 0, 1, 1], [], []>} : vector<16x16xf32>, vector<16x256xf32>, vector<16x256xf32> -> vector<16x256xf32>
    %cst_8 = arith.constant 0.000000e+00 : f32
    %8 = vector.broadcast %cst_8 : f32 to vector<16x256xf32>
    %9 = arith.maximumf %7, %8 : vector<16x256xf32>
    %c0_9 = arith.constant 0 : index
    %c0_10 = arith.constant 0 : index
    %10 = vector.load %arg5[%c0_9, %c0_10] : memref<8x16xf32, #tpu.memory_space<vmem>>, vector<8x16xf32>
    %cst_11 = arith.constant dense<0.000000e+00> : vector<8x256xf32>
    %11 = tpu.matmul %10, %9, %cst_11 {dimension_numbers = #tpu.dot_dimension_numbers<[1], [0], [0], [1], [0, 0, 1, 1], [], []>} : vector<8x16xf32>, vector<16x256xf32>, vector<8x256xf32> -> vector<8x256xf32>
    %c0_12 = arith.constant 0 : index
    %c0_13 = arith.constant 0 : index
    %c0_14 = arith.constant 0 : index
    %12 = vector.load %arg6[%c0_12, %c0_13, %c0_14] : memref<1x8x256xf32, #tpu.memory_space<vmem>>, vector<1x8x256xf32>
    %13 = vector.shape_cast %12 : vector<1x8x256xf32> to vector<8x256xf32>
    %14 = vector.shape_cast %11 : vector<8x256xf32> to vector<1x8x256xf32>
    tpu.vector_store %arg6[%c0_12, %c0_13, %c0_14], %14 {strides = array<i32>} : memref<1x8x256xf32, #tpu.memory_space<vmem>>, vector<1x8x256xf32>,
    return
  }
  func.func @transform_0(%arg0: i32, %arg1: i32) -> (i32, i32, i32) {
    %c0_i32 = arith.constant 0 : i32
    %c0_i32_0 = arith.constant 0 : i32
    return %arg0, %c0_i32, %arg1 : i32, i32, i32
  }
  func.func @transform_1(%arg0: i32, %arg1: i32) -> (i32, i32) {
    %c0_i32 = arith.constant 0 : i32
    %c0_i32_0 = arith.constant 0 : i32
    %c0_i32_1 = arith.constant 0 : i32
    return %c0_i32, %c0_i32_0 : i32, i32
  }
  func.func @transform_2(%arg0: i32, %arg1: i32) -> (i32, i32) {
    %c0_i32 = arith.constant 0 : i32
    %c0_i32_0 = arith.constant 0 : i32
    %c0_i32_1 = arith.constant 0 : i32
    return %c0_i32, %c0_i32_0 : i32, i32
  }
  func.func @transform_3(%arg0: i32, %arg1: i32) -> (i32, i32) {
    %c0_i32 = arith.constant 0 : i32
    %c0_i32_0 = arith.constant 0 : i32
    %c0_i32_1 = arith.constant 0 : i32
    return %c0_i32, %c0_i32_0 : i32, i32
  }
  func.func @transform_4(%arg0: i32, %arg1: i32) -> (i32, i32, i32) {
    %c0_i32 = arith.constant 0 : i32
    %c0_i32_0 = arith.constant 0 : i32
    return %arg0, %c0_i32, %arg1 : i32, i32, i32
  }
}

</mosaic_0001>

<bundles_post_ra>
// kernel: tpu_custom_call.1
= control target key start
LH: loop header
LB: loop body
LE: loop exit
PB: predicated region body
PF: predicated region fallthrough
CT: control target
= control target key end

     0   :  { %9 = vsyncpa [#allocation3], 0  ;;  %s1018_s0 = inlined_call_operand.vmem [shape: f32[2,4,256], index: 0, kind: input, shape index: {}]   ;;  %s1019_s1 = inlined_call_operand.vmem [shape: f32[16,4], index: 1, kind: input, shape index: {}]   ;;  %s1020_s2 = inlined_call_operand.hbm [shape: f32[16,16], index: 2, kind: input, shape index: {}]   ;;  %s1021_s3 = inlined_call_operand.vmem [shape: f32[8,16], index: 3, kind: input, shape index: {}]   ;;  %s1022_s4 = inlined_call_operand.hbm [shape: f32[2,8,256], index: 4, kind: output, shape index: {}]  }
   0x1   :  { %10 = vsyncpa [#allocation4], 0 }
   0x2   :  { %12 = vsyncpa [#allocation4 + $0x1], 0  ;;  %s856_s15 = smov 0   ;;  %s858_s16 = smov 0  }
   0x3   :  { %s860_s17 = smov 0   ;;  %s862_s18 = smov 0  }
   0x4   :  { %s864_s19 = smov 0   ;;  %s866_s20 = smov 0  }
   0x5 LB: > { %s612_s21 = sadd.s32 4294967295, %s824_s20   ;;  %s613_s22 = sadd.s32 4294967294, %s824_s20   ;;  %s824_s20 = sphi %s866_s20, %s18_s20   ;;  %s820_s19 = sphi %s864_s19, %s1040_s19   ;;  %s816_s18 = sphi %s862_s18, %s1039_s18   ;;  %s812_s17 = sphi %s860_s17, %s1038_s17   ;;  %s808_s16 = sphi %s858_s16, %s1037_s16   ;;  %s804_s15 = sphi %s856_s15, %s1036_s15  }
   0x6   : > { %s30_s23 = sadd.s32 1, %s820_s19  ;;  %s130_s24 = sadd.s32 1, %s812_s17 }
   0x7   : > { %p32_p0 = scmp.ge.s32.totalorder %s30_s23, 2  ;;  %p140_p1 = scmp.ne.s32.totalorder %s812_s17, %s808_s16 }
   0x8   : > { %p141_p2 = scmp.eq.s32.totalorder %s612_s21, 1  ;;  %p146_p3 = scmp.ne.s32.totalorder %s808_s16, %s804_s15 }
   0x9   : > { %s1042_s23 = smov (%p32_p0, %s30_s23), 0  ;;  %p147_p5 = scmp.eq.s32.totalorder %s613_s22, 1 }
   0xa   : > { %p896_p4 = por %p141_p2, %p140_p1  ;;  %s125_s26 = ssub.s32 %s820_s19, %s1042_s23 }
   0xb   : > { %p614_p6 = scmp.ge.s32.totalorder %s824_s20, 1  ;;  %p128_p7 = scmp.eq.s32.totalorder %s125_s26, 0 }
   0xc   : > { %s1027_s25 = scalar_select %p896_p4, 1, 0 }
   0xd   : > { %p903_p8 = por %p147_p5, %p146_p3  ;;  %p154_p9 = scmp.lt.s32.totalorder %s824_s20, 3 }
   0xe   : > { %s909_s28 = scalar_select %p128_p7, %s812_s17, %s130_s24  }
   0xf   : > { %s1028_s27 = scalar_select %p903_p8, 1, 0 }
  0x10   : > { %p911_p10 = pnand %p614_p6, %p154_p9  ;;  %p915_p11 = scmp.eq.s32.totalorder %s612_s21, 0 }
  0x11   : > { %s826_s5 = smov [#allocation2]   ;;  %s714_s10 = scalar_lea.hbm %s1020_s2, 256 }
  0x12   : > { %s1029_s29 = scalar_select %p911_p10, 1, 0 }
  0x13   : > { %s1030_s30 = scalar_select %p915_p11, 1, 0 }
  0x14   : > { %p650_p12 = pneg %p911_p10  ;;  %s169_s6 = sshll.u32 %s826_s5, 4  ;;  %s170_s6 = int_to_ptr.vmem [resolvable:$true] %s169_s6 }
  0x15   : > { %p715_p0 = scmp.ne.s32.totalorder %s1020_s2, %s714_s10  ;;  %p721_p5 = scmp.lt.u32.totalorder %s714_s10, %s1020_s2 }
  0x16   : > { %p923_p13 = pnand %p915_p11, %p650_p12 }
  0x18   : > { %p716_p1 = pneg %p923_p13 }
  0x1a   : > { %p717_p2 = pnand %p716_p1, %p715_p0 }
  0x1c   : > { %p718_p3 = pneg %p717_p2 }
  0x1e   : > { %p723_p6 = pnand %p721_p5, %p718_p3 }
  0x20   : > { %726 = shalt.err (!%p723_p6)
}
  0x21   : > { %s727_s21 = scalar_lea.vmem %s170_s6, 256  ;;  %p735_p8 = scmp.lt.s32.totalorder %s170_s6, %s170_s6 }
  0x22   : > { %p728_p7 = scmp.ne.s32.totalorder %s170_s6, %s727_s21  ;;  %p736_p4 = scmp.lt.s32.totalorder %s727_s21, %s727_s21 }
  0x24   : > { %p730_p9 = pnand %p728_p7, %p716_p1  ;;  %p737_p11 = por %p736_p4, %p735_p8 }
  0x26   : > { %p731_p12 = pneg %p730_p9 }
  0x28   : > { %p738_p10 = pnand %p737_p11, %p731_p12 }
  0x2a   : > { %741 = shalt.err (!%p738_p10)
}
  0x2b   : > { %s827_s22 = smov 128   ;;  %s828_s24 = smov 8  }
  0x2c   : > { %653 = dma.hbm_to_vmem [thread:$0]  (!%p923_p13), %s1020_s2, 256, %s170_s6, [#allocation3], %s827_s22, %s827_s22, %s828_s24  }
  0x2d   : > { %p1032_p0 = scmp.ne.s32.totalorder %s1029_s29, 0 }
  0x2e   : > { %p1033_p2 = scmp.ne.s32.totalorder (!%p1032_p0), %s1030_s30, 0 }
  0x2f   : > { %201 = sbr.rel (%p1032_p0) target bundleno = 743 (0x2e7), region = 36 }
  0x36   : > { %795 = dma.done.wait (%p1033_p2), [#allocation3], 256  }
  0x37   : > { %797 = vsyncadd (%p1033_p2), [#allocation3], 4294967040  ;;  %p232_p4 = scmp.lt.s32.totalorder %s816_s18, 1  ;;  %v829_v0 = vmov 0.0   ;;  %vm254_vm0 = vcmask 1043456   ;;  %v243_v3 = vld [vmem:[%s1019_s1] sm:$0xff] }
  0x38   : > { %323 = vmatprep.mubr.f32.mxu0 %v829_v0  ;;  %413 = vmatprep.mubr.f32.mxu1 %v829_v0  ;;  %vm247_vm1 = vcmask 31744   ;;  %v244_v4 = vld [vmem:[%s1019_s1 + $0x8] sm:$0xff]  ;;  %v340_v15 = vld [vmem:[#allocation2] sm:$0xff]  ;;  %vm342_vm2 = vcmask 130048   ;;  %s228_s21 = sand.u32 1, %s808_s16   ;;  %s635_s5 = sshll.u32 %s816_s18, 8 }
  0x39   : > { %s233_s7 = scalar_select %p232_p4, %s816_s18, 1  ;;  %v341_v16 = vld [vmem:[#allocation2 + $0x8] sm:$0xff]  ;;  %v430_v27 = vld [vmem:[%s1021_s3] sm:$0xff] }
  0x3a   : > { %s619_s22 = sshll.u32 %s228_s21, 4  ;;  %s973_s9 = scalar_lea.hbm %s1022_s4, %s635_s5 }
  0x3b   : > { %s634_s8 = sshll.u32 %s233_s7, 3  ;;  %s230_s24 = scalar_lea.vmem [#allocation5], %s619_s22 }
  0x3c   : > { %s239_s6 = scalar_lea.vmem %s1018_s0, %s634_s8  ;;  %s524_s26 = sshll.u32 %s230_s24, 4  ;;  %s968_s26 = int_to_ptr.vmem [resolvable:$true] %s524_s26 }
  0x3d   : > { %v242_v1 = vld [vmem:[%s239_s6] sm:$0xff]  ;;  %s508_s10 = scalar_lea.sflag [#allocation4], %s228_s21  ;;  %s742_s6 = scalar_lea.vmem %s968_s26, 256 }
  0x3e   : > { %v246_v2 = vcombine.high %v242_v1, %v242_v1  ;;  %p743_p8 = scmp.ne.s32.totalorder %s968_s26, %s742_s6  ;;  %p1034_p10 = scmp.ne.s32.totalorder %s1027_s25, 0 }
  0x3f   : > { %s830_s18 = smov [#allocation5]  }
  0x40   : > { %622 = vmatprep.subr.msk.mxu0 %vm254_vm0, %v246_v2  ;;  %p744_p11 = pnand %p743_p8, %p1034_p10  ;;  %s746_s29 = sshll.u32 %s830_s18, 4  ;;  %s747_s29 = int_to_ptr.vmem [resolvable:$false] %s746_s29 }
  0x41   : > { %623 = vmatpush1.msk.msra.mxu0 %vm254_vm0, %v242_v1  ;;  %s748_s11 = scalar_lea.vmem %s747_s29, 512  ;;  %p749_p1 = scmp.lt.s32.totalorder %s968_s26, %s747_s29 }
  0x42   : > { %624 = vmatmul.mubr.msk.f32.vlgmr.msra.gmra.mrb[0].mxu0 %vm247_vm1, %v243_v3  ;;  %p745_p13 = pneg %p744_p11  ;;  %p750_p3 = scmp.lt.s32.totalorder %s748_s11, %s742_s6 }
  0x43   : > { %329 = vmatprep.mubr.f32.mxu0 %v829_v0 }
  0x44   : > { %p751_p5 = por %p750_p3, %p749_p1 }
  0x46   : > { %625 = vmatmul.mubr.msk.f32.gmra.mrb[2].mxu0 %vm247_vm1, %v244_v4  ;;  %p752_p6 = pnand %p751_p5, %p745_p13 }
  0x47   : > { %498 = vmatprep.mubr.f32.mxu0 %v829_v0 }
 0x115   : > { %v325_v5 = vpop.f32.mrb[0].mxu0 }
 0x116   : > { %v327_v6 = vpop.f32.mrb[1].mxu0  ;;  %v336_v8 = vmax.f32 %v325_v5, 0.0 }
 0x117   : > { %v337_v11 = vmax.f32 %v327_v6, 0.0 }
 0x119   : > { %v331_v7 = vpop.f32.mrb[2].mxu0 }
 0x11a   : > { %v338_v9 = vmax.f32 %v331_v7, 0.0  ;;  %v333_v10 = vpop.f32.mrb[3].mxu0 }
 0x11b   : > { %v339_v12 = vmax.f32 %v333_v10, 0.0 }
 0x11c   : > { %v638_v13 = vpack.c.bf16 %v338_v9, %v336_v8 }
 0x11d   : > { %v636_v14 = vpack.c.bf16 %v339_v12, %v337_v11 }
 0x11f   : > { %637 = vmatprep.subr.bf16.mxu1 %v636_v14 }
 0x120   : > { %639 = vmatpush1.bf16.msra.mxu1 %v638_v13 }
 0x123   : > { %626 = vmatmul.mubr.msk.f32.vlgmr.msra.gmra.mrb[0].mxu1 %vm342_vm2, %v340_v15 }
 0x124   : > { %419 = vmatprep.mubr.f32.mxu1 %v829_v0 }
 0x127   : > { %627 = vmatmul.mubr.msk.f32.gmra.mrb[2].mxu1 %vm342_vm2, %v341_v16 }
 0x1f6   : > { %v415_v17 = vpop.f32.mrb[0].mxu1 }
 0x1f7   : > { %v417_v18 = vpop.f32.mrb[1].mxu1  ;;  %v426_v20 = vmax.f32 %v415_v17, 0.0 }
 0x1f8   : > { %v427_v23 = vmax.f32 %v417_v18, 0.0 }
 0x1fa   : > { %v421_v19 = vpop.f32.mrb[2].mxu1 }
 0x1fb   : > { %v428_v21 = vmax.f32 %v421_v19, 0.0  ;;  %v423_v22 = vpop.f32.mrb[3].mxu1 }
 0x1fc   : > { %v429_v24 = vmax.f32 %v423_v22, 0.0 }
 0x1fd   : > { %v642_v25 = vpack.c.bf16 %v428_v21, %v426_v20 }
 0x1fe   : > { %v640_v26 = vpack.c.bf16 %v429_v24, %v427_v23 }
 0x200   : > { %641 = vmatprep.subr.bf16.mxu0 %v640_v26 }
 0x201   : > { %643 = vmatpush1.bf16.msra.mxu0 %v642_v25 }
 0x204   : > { %628 = vmatmul.mubr.msk.f32.vlgmr.msra.gmra.mrb[4].mxu0 %vm342_vm2, %v430_v27 }
 0x2d7   : > { %v500_v28 = vpop.f32.mrb[4].mxu0 }
 0x2d8   : > { %505 = vst [vmem:[%s230_s24] sm:$0xff] %v500_v28  ;;  %v502_v29 = vpop.f32.mrb[5].mxu0 }
 0x2d9   : > { %506 = vst [vmem:[%s230_s24 + $0x8] sm:$0xff] %v502_v29 }
 0x2da   : > { %755 = shalt.err (!%p752_p6)
}
 0x2db   : > { %s756_s30 = scalar_lea.hbm %s973_s9, 256  ;;  %s760_s14 = scalar_lea.hbm %s1022_s4, 512 }
 0x2dc   : > { %p757_p7 = scmp.ne.s32.totalorder %s973_s9, %s756_s30  ;;  %p761_p0 = scmp.lt.u32.totalorder %s973_s9, %s1022_s4 }
 0x2dd   : > { %p762_p2 = scmp.lt.u32.totalorder %s760_s14, %s756_s30  ;;  %p764_p8 = scmp.lt.u32.totalorder %s756_s30, %s973_s9 }
 0x2de   : > { %p758_p9 = pnand %p757_p7, %p1034_p10 }
 0x2df   : > { %p763_p4 = por %p762_p2, %p761_p0 }
 0x2e0   : > { %p759_p12 = pneg %p758_p9 }
 0x2e1   : > { %p765_p11 = por %p764_p8, %p763_p4 }
 0x2e3   : > { %p766_p13 = pnand %p765_p11, %p759_p12 }
 0x2e5   : > { %769 = shalt.err (!%p766_p13)
}
 0x2e6   : > { %648 = dma.vmem_to_hbm [thread:$0]  (%p1034_p10), %s968_s26, 256, %s973_s9, %s508_s10  }
 0x2e7 PF: > { %p660_p1 = scmp.ge.s32.totalorder %s824_s20, 2  ;;  %s536_s24 = sand.u32 1, %s804_s15  }
 0x2e8   : > { %p1035_p3 = scmp.ne.s32.totalorder %s1028_s27, 0  ;;  %s537_s5 = scalar_lea.sflag [#allocation4], %s536_s24 }
 0x2ea   : > { %p655_p5 = pnand %p660_p1, %p1035_p3 }
 0x2ec   : > { %799 = dma.done.wait (!%p655_p5), %s537_s5, 256  }
 0x2ed   : > { %801 = vsyncadd (!%p655_p5), %s537_s5, 4294967040  ;;  %s18_s20 = sadd.s32 1, %s824_s20   ;;  %s1036_s15 = smov %s808_s16 }
 0x2ee   : > { %p15_p6 = scmp.ge.s32.totalorder %s18_s20, 4   ;;  %s1037_s16 = smov %s812_s17 }
 0x2ef   : > { %s1038_s17 = smov %s909_s28  ;;  %s1039_s18 = smov %s820_s19 }
 0x2f0   : > { %s1040_s19 = smov %s1042_s23  ;;  %17 = sbr.rel (!%p15_p6) target bundleno = 5 (0x5), region = 76 }
 0x2f7   :  { %542 = vsyncpa [#allocation3], 1 }
 0x2f8   :  { %544 = vsyncpa [#allocation3 + $0x1], 1 }
 0x2f9   :  { %545 = vsyncpa [#allocation4], 1 }
 0x2fa   :  { %547 = vsyncpa [#allocation4 + $0x1], 1 }

</bundles_post_ra>
